<compile_context>
chip_gen: v7x
topology: tpu7x:2x2x1
jax: 0.10.0
libtpu: 0.0.40
codegen_flags: <defaults>
</compile_context>

<pallas_src>
import functools
import math

import jax
import jax.numpy as jnp
from jax import lax
from jax.experimental import pallas as pl
from jax.experimental.pallas import tpu as pltpu


def _round_up(x, m):
    return (x + m - 1) // m * m


# ----------------------------------------------------------------------------
# Kernel 1: sample weights/bias (mu + exp(sigma) * eps) and compute the KL sum.
# Tiled over OC (1-D grid); KL accumulates into a resident (1,1) output block.
# Padded rows/cols (mu = sigma = eps = 0) sample to exactly 0 and are masked
# out of the KL, so the kernel emits the fully padded (CKK_pad, OC_pad) weight
# in the MXU dtype directly — no extra pad/cast pass in the wrapper.
# ----------------------------------------------------------------------------
def _make_sample_kl_kernel(sigma_0, ckk, oc, toc):
    log_s0 = math.log(sigma_0)
    inv_2s0sq = 1.0 / (2.0 * sigma_0 * sigma_0)

    def kernel(mu_w_ref, sg_w_ref, ep_w_ref,
               mu_b_ref, sg_b_ref, ep_b_ref,
               w_ref, b_ref, kl_ref):
        j = pl.program_id(0)

        @pl.when(j == 0)
        def _init():
            kl_ref[...] = jnp.zeros_like(kl_ref)

        col0 = j * toc

        mu_w = mu_w_ref[...]
        sg_w = sg_w_ref[...]
        sig_w = jnp.exp(sg_w)                              # EUP, f32
        w_ref[...] = (mu_w + sig_w * ep_w_ref[...]).astype(w_ref.dtype)
        kl_w = log_s0 - sg_w + (sig_w * sig_w + mu_w * mu_w) * inv_2s0sq - 0.5
        rows = lax.broadcasted_iota(jnp.int32, kl_w.shape, 0)
        cols = lax.broadcasted_iota(jnp.int32, kl_w.shape, 1) + col0
        kl_w = jnp.where((rows < ckk) & (cols < oc), kl_w, 0.0)

        mu_b = mu_b_ref[...]
        sg_b = sg_b_ref[...]
        sig_b = jnp.exp(sg_b)
        b_ref[...] = mu_b + sig_b * ep_b_ref[...]
        kl_b = log_s0 - sg_b + (sig_b * sig_b + mu_b * mu_b) * inv_2s0sq - 0.5
        cols_b = lax.broadcasted_iota(jnp.int32, kl_b.shape, 1) + col0
        kl_b = jnp.where(cols_b < oc, kl_b, 0.0)

        kl_ref[...] = kl_ref[...] + (jnp.sum(kl_w) + jnp.sum(kl_b))

    return kernel


def sample_and_kl(mu_w, sg_w, ep_w, mu_b, sg_b, ep_b, *, sigma_0, ckk, oc,
                  weight_dtype=jnp.bfloat16, toc=128):
    """Inputs already in (CKK_pad, OC_pad) / (1, OC_pad) layout, zero-padded.

    Returns (weight (CKK_pad, OC_pad) weight_dtype, bias (1, OC_pad) f32, kl f32).
    """
    ckk_pad, oc_pad = mu_w.shape
    assert oc_pad % toc == 0
    grid = (oc_pad // toc,)
    # TODO(synk): also tile over CKK for very large CKK*toc blocks (v5e 16 MiB
    #             default scoped VMEM) — needs a 2-D grid with the same resident
    #             KL accumulator.
    w_spec = pl.BlockSpec((ckk_pad, toc), lambda j: (0, j))
    b_spec = pl.BlockSpec((1, toc), lambda j: (0, j))
    kl_spec = pl.BlockSpec((1, 1), lambda j: (0, 0))

    w, b, kl = pl.pallas_call(
        _make_sample_kl_kernel(sigma_0, ckk, oc, toc),
        out_shape=(
            jax.ShapeDtypeStruct((ckk_pad, oc_pad), weight_dtype),  # sampled W
            jax.ShapeDtypeStruct((1, oc_pad), jnp.float32),         # sampled bias
            jax.ShapeDtypeStruct((1, 1), jnp.float32),              # KL sum
        ),
        grid=grid,
        in_specs=[w_spec, w_spec, w_spec, b_spec, b_spec, b_spec],
        out_specs=(w_spec, b_spec, kl_spec),
        compiler_params=pltpu.CompilerParams(dimension_semantics=("arbitrary",)),
    )(mu_w, sg_w, ep_w, mu_b, sg_b, ep_b)
    return w, b, kl[0, 0]


# ----------------------------------------------------------------------------
# Kernel 2: tiled conv-as-matmul:  out = patches @ weight + bias
#   patches (M, CKK_pad)        blocks (tm, tk)   (bf16)
#   weight  (CKK_pad, OC_pad)   blocks (tk, tn)   (bf16, natural MXU (K,N) layout)
#   out     (M, OC_pad)         blocks (tm, tn)   (f32, lane-dense: tn % 128 == 0)
# ----------------------------------------------------------------------------
def _conv_matmul_kernel_single_k(p_ref, w_ref, b_ref, o_ref):
    # Single k step: write the output directly, no accumulator round trip.
    o_ref[...] = (jnp.dot(p_ref[...], w_ref[...],
                          preferred_element_type=jnp.float32)
                  + b_ref[...]).astype(o_ref.dtype)


def _conv_matmul_kernel_multi_k(p_ref, w_ref, b_ref, o_ref, acc_ref):
    k = pl.program_id(2)

    @pl.when(k == 0)
    def _init():
        acc_ref[...] = jnp.zeros_like(acc_ref)

    acc_ref[...] += jnp.dot(p_ref[...], w_ref[...],
                            preferred_element_type=jnp.float32)

    @pl.when(k == pl.num_programs(2) - 1)
    def _finalize():
        o_ref[...] = (acc_ref[...] + b_ref[...]).astype(o_ref.dtype)


def conv_matmul(patches, weight, bias_row, *, tm=512, tn=None, tk=None,
                vmem_limit_bytes=None):
    """patches (M, CKK_pad), weight (CKK_pad, OC_pad), bias_row (1, OC_pad).

    Returns (M, OC_pad) f32. CKK_pad / OC_pad are already padded by the caller
    (zeros, so padding contributes exact zeros to the contraction); the M axis
    may be ragged — the partial last block's garbage rows are never stored.
    """
    m, ckk_pad = patches.shape
    ckk_pad_w, oc_pad = weight.shape
    assert ckk_pad == ckk_pad_w and bias_row.shape == (1, oc_pad)
    assert oc_pad % 128 == 0

    if tn is None:
        # Full OC when modest: the weight's block index is then constant across
        # the M axis and Pallas keeps it VMEM-resident (no HBM re-fetch).
        tn = oc_pad if oc_pad <= 1024 else 512
    if tk is None:
        tk = ckk_pad if ckk_pad <= 2048 else 512
    tm = min(tm, _round_up(m, 8))

    grid = (pl.cdiv(m, tm), pl.cdiv(oc_pad, tn), pl.cdiv(ckk_pad, tk))
    n_k = grid[2]
    if n_k == 1:
        kernel = _conv_matmul_kernel_single_k
        scratch = []
    else:
        assert ckk_pad % tk == 0, "contraction dim must be padded to the k tile"
        kernel = _conv_matmul_kernel_multi_k
        scratch = [pltpu.VMEM((tm, tn), jnp.float32)]

    # Keep the scoped-VMEM limit above what double-buffered tiles need when
    # sweeping tiles up (v5e default is only 16 MiB); stay well under v7x's
    # 64 MiB physical VMEM. Not triggered for small tiles.
    if vmem_limit_bytes is None:
        itm = patches.dtype.itemsize
        est = (2 * (tm * tk * itm + tk * tn * itm + tn * 4)
               + 2 * tm * tn * 4 + tm * tn * 4)
        if est > 12 * (1 << 20):
            vmem_limit_bytes = min(2 * est, 48 * (1 << 20))

    out = pl.pallas_call(
        kernel,
        out_shape=jax.ShapeDtypeStruct((m, oc_pad), jnp.float32),
        grid_spec=pltpu.PrefetchScalarGridSpec(
            num_scalar_prefetch=0,
            grid=grid,
            in_specs=[
                # TODO(synk): pipeline_mode=pl.Buffered(3) on the patch stream if
                #             its DMA is still exposed after bf16 + larger tiles.
                pl.BlockSpec((tm, tk), lambda i, j, k: (i, k)),   # patches
                pl.BlockSpec((tk, tn), lambda i, j, k: (k, j)),   # weight (K,N)
                pl.BlockSpec((1, tn), lambda i, j, k: (0, j)),    # bias row
            ],
            out_specs=pl.BlockSpec((tm, tn), lambda i, j, k: (i, j)),
            scratch_shapes=scratch,
        ),
        compiler_params=pltpu.CompilerParams(
            dimension_semantics=("parallel", "parallel", "arbitrary"),
            vmem_limit_bytes=vmem_limit_bytes),
    )(patches, weight, bias_row)
    return out


# ----------------------------------------------------------------------------
# Glue: NHWC im2col (plain JAX), parameter setup, full forward.
# ----------------------------------------------------------------------------
def im2col_nhwc(x_nhwc, kernel_size, stride, padding, dilation, ckk_pad):
    """x_nhwc: (N, H, W, C) -> patches (N*OH*OW, ckk_pad), plus (OH, OW).

    Patch element order is ky*K*C + kx*C + c, matching the (K, K, C, OC)-reshaped
    weight. The contraction-dim zero padding is emitted in place (no extra
    full-size jnp.pad pass), and there is no 5-D stack + big transpose.
    """
    n, h, w, c = x_nhwc.shape
    k = kernel_size
    xp = jnp.pad(x_nhwc, ((0, 0), (padding, padding), (padding, padding), (0, 0)))
    hp, wp = h + 2 * padding, w + 2 * padding
    oh = (hp - dilation * (k - 1) - 1) // stride + 1
    ow = (wp - dilation * (k - 1) - 1) // stride + 1
    cols = []
    for ky in range(k):
        for kx in range(k):
            y0, x0 = ky * dilation, kx * dilation
            cols.append(xp[:, y0:y0 + stride * oh:stride,
                           x0:x0 + stride * ow:stride, :])      # (N, OH, OW, C)
    if ckk_pad > k * k * c:
        cols.append(jnp.zeros((n, oh, ow, ckk_pad - k * k * c), x_nhwc.dtype))
    patches = jnp.concatenate(cols, axis=-1).reshape(n * oh * ow, ckk_pad)
    return patches, oh, ow


def rand_conv2d_forward(x, params, eps_w, eps_b, *, sigma_0, kernel_size,
                        stride, padding, dilation, mxu_dtype=jnp.bfloat16):
    """x: (N, C, H, W) float32. Returns (out NCHW f32, kl scalar f32)."""
    n, c, h, w_in = x.shape
    oc = params["mu_weight"].shape[0]
    k = kernel_size
    ckk = c * k * k

    oc_pad = _round_up(oc, 128)                      # lane-dense output columns
    # Small-CKK layers: no 128x inflation of the contraction dim — round to a
    # multiple of 8 only; larger layers pad to the 512-wide k tile.
    ckk_pad = _round_up(ckk, 8) if ckk <= 2048 else _round_up(ckk, 512)

    def to_kkc_oc(a):                                # (OC,C,K,K) -> (ckk_pad, oc_pad)
        a = jnp.transpose(a, (2, 3, 1, 0)).reshape(ckk, oc)
        return jnp.pad(a, ((0, ckk_pad - ckk), (0, oc_pad - oc)))

    def to_row(a):                                   # (OC,) -> (1, oc_pad)
        return jnp.pad(a.reshape(1, oc), ((0, 0), (0, oc_pad - oc)))

    # Pallas kernel 1: reparameterized sample (emitted in the MXU dtype, padded,
    # natural (K, N) layout) + masked KL reduction.
    w2d, b2d, kl = sample_and_kl(
        to_kkc_oc(params["mu_weight"]), to_kkc_oc(params["sigma_weight"]),
        to_kkc_oc(eps_w),
        to_row(params["mu_bias"]), to_row(params["sigma_bias"]), to_row(eps_b),
        sigma_0=sigma_0, ckk=ckk, oc=oc, weight_dtype=mxu_dtype)

    # Cast activations to the MXU dtype *before* im2col so the K^2-inflated
    # patch stream through HBM is half-width.
    x_nhwc = jnp.transpose(x, (0, 2, 3, 1)).astype(mxu_dtype)
    patches, oh, ow = im2col_nhwc(x_nhwc, k, stride, padding, dilation, ckk_pad)

    # Pallas kernel 2: tiled MXU matmul (f32 accumulation) + bias.
    out_flat = conv_matmul(patches, w2d, b2d)        # (N*OH*OW, oc_pad) f32

    # TODO(synk): keep NHWC downstream to avoid this final transpose HBM pass.
    out = out_flat.reshape(n, oh, ow, oc_pad)[:, :, :, :oc].transpose(0, 3, 1, 2)
    return out, kl


def init_params(key, in_channels, out_channels, kernel_size, init_s):
    n = in_channels * kernel_size ** 2
    stdv = 1.0 / math.sqrt(n)
    k1, k2 = jax.random.split(key)
    mu_w = jax.random.uniform(
        k1, (out_channels, in_channels, kernel_size, kernel_size),
        minval=-stdv, maxval=stdv, dtype=jnp.float32)
    sg_w = jnp.full((out_channels, in_channels, kernel_size, kernel_size),
                    init_s, dtype=jnp.float32)
    mu_b = jax.random.uniform(k2, (out_channels,), minval=-stdv, maxval=stdv,
                              dtype=jnp.float32)
    sg_b = jnp.full((out_channels,), init_s, dtype=jnp.float32)
    return {"mu_weight": mu_w, "sigma_weight": sg_w,
            "mu_bias": mu_b, "sigma_bias": sg_b}


def reference_forward(x, params, sigma_0, stride, padding, dilation, eps_w, eps_b):
    """Pure-JAX f32 reference for correctness checking."""
    sig_w = jnp.exp(params["sigma_weight"])
    weight = params["mu_weight"] + sig_w * eps_w
    kl_w = (math.log(sigma_0) - params["sigma_weight"]
            + (sig_w ** 2 + params["mu_weight"] ** 2) / (2 * sigma_0 ** 2) - 0.5)
    sig_b = jnp.exp(params["sigma_bias"])
    bias = params["mu_bias"] + sig_b * eps_b
    kl_b = (math.log(sigma_0) - params["sigma_bias"]
            + (sig_b ** 2 + params["mu_bias"] ** 2) / (2 * sigma_0 ** 2) - 0.5)
    out = lax.conv_general_dilated(
        x, weight, window_strides=(stride, stride),
        padding=[(padding, padding), (padding, padding)],
        rhs_dilation=(dilation, dilation),
        dimension_numbers=("NCHW", "OIHW", "NCHW"))
    out = out + bias[None, :, None, None]
    return out, jnp.sum(kl_w) + jnp.sum(kl_b)


if __name__ == "__main__":
    # Module hyperparameters (small, consistent with RandConv2d.__init__).
    sigma_0 = 0.1
    init_s = math.log(0.1)
    in_channels, out_channels = 4, 8
    kernel_size, stride, padding, dilation = 3, 1, 1, 1

    key = jax.random.PRNGKey(0)
    kp, kx, kew, keb = jax.random.split(key, 4)

    params = init_params(kp, in_channels, out_channels, kernel_size, init_s)
    x = jax.random.normal(kx, (2, in_channels, 16, 16), dtype=jnp.float32)
    # Deterministic reparameterization noise (fix=True style, seeded here).
    eps_w = jax.random.normal(
        kew, (out_channels, in_channels, kernel_size, kernel_size),
        dtype=jnp.float32)
    eps_b = jax.random.normal(keb, (out_channels,), dtype=jnp.float32)

    fwd = jax.jit(functools.partial(
        rand_conv2d_forward, sigma_0=sigma_0, kernel_size=kernel_size,
        stride=stride, padding=padding, dilation=dilation))

    out, kl = fwd(x, params, eps_w, eps_b)
    out = jax.block_until_ready(out)
    kl = jax.block_until_ready(kl)

    # Sanity check against the pure-JAX f32 reference. The matmul runs with bf16
    # MXU inputs (f32 accumulation), so the conv output tolerance is relaxed
    # accordingly; the KL path is exact f32.
    out_ref, kl_ref = reference_forward(
        x, params, sigma_0, stride, padding, dilation, eps_w, eps_b)
    assert out.shape == (2, out_channels, 16, 16)
    assert jnp.allclose(out, out_ref, atol=5e-2, rtol=5e-2)
    assert jnp.allclose(kl, kl_ref, atol=1e-2, rtol=1e-3)

    print("KERNEL_OK")
</pallas_src>

<mosaic_0001>
module attributes {stable_mosaic.version = 11 : i64} {
  func.func @_conv_matmul_kernel_single_k(%arg0: i32, %arg1: i32, %arg2: i32, %arg3: memref<512x40xbf16, #tpu.memory_space<vmem>>, %arg4: memref<40x128xbf16, #tpu.memory_space<vmem>>, %arg5: memref<1x128xf32, #tpu.memory_space<vmem>>, %arg6: memref<512x128xf32, #tpu.memory_space<vmem>>) attributes {dimension_semantics = [#tpu.dimension_semantics<parallel>, #tpu.dimension_semantics<parallel>, #tpu.dimension_semantics<arbitrary>], iteration_bounds = array<i64: 1, 1, 1>, scalar_prefetch = 0 : i64, scratch_operands = 0 : i64, tpu.core_type = #tpu.core_type<tc>, window_params = [{transform_indices = @transform_0, window_bounds = array<i64: 512, 40>}, {transform_indices = @transform_1, window_bounds = array<i64: 40, 128>}, {transform_indices = @transform_2, window_bounds = array<i64: 1, 128>}, {transform_indices = @transform_3, window_bounds = array<i64: 512, 128>}]} {
    %c0 = arith.constant 0 : index
    %c0_0 = arith.constant 0 : index
    %0 = vector.load %arg3[%c0, %c0_0] : memref<512x40xbf16, #tpu.memory_space<vmem>>, vector<512x40xbf16>
    %c0_1 = arith.constant 0 : index
    %c0_2 = arith.constant 0 : index
    %1 = vector.load %arg4[%c0_1, %c0_2] : memref<40x128xbf16, #tpu.memory_space<vmem>>, vector<40x128xbf16>
    %cst = arith.constant dense<0.000000e+00> : vector<512x128xf32>
    %2 = tpu.matmul %0, %1, %cst {dimension_numbers = #tpu.dot_dimension_numbers<[1], [0], [0], [1], [0, 0, 1, 1], [], []>} : vector<512x40xbf16>, vector<40x128xbf16>, vector<512x128xf32> -> vector<512x128xf32>
    %c0_3 = arith.constant 0 : index
    %c0_4 = arith.constant 0 : index
    %3 = vector.load %arg5[%c0_3, %c0_4] : memref<1x128xf32, #tpu.memory_space<vmem>>, vector<1x128xf32>
    %4 = vector.broadcast %3 : vector<1x128xf32> to vector<512x128xf32>
    %5 = arith.addf %2, %4 : vector<512x128xf32>
    %c0_5 = arith.constant 0 : index
    %c0_6 = arith.constant 0 : index
    %6 = vector.load %arg6[%c0_5, %c0_6] : memref<512x128xf32, #tpu.memory_space<vmem>>, vector<512x128xf32>
    tpu.vector_store %arg6[%c0_5, %c0_6], %5 {strides = array<i32>} : memref<512x128xf32, #tpu.memory_space<vmem>>, vector<512x128xf32>,
    return
  }
  func.func @transform_0(%arg0: i32, %arg1: i32, %arg2: i32) -> (i32, i32) {
    %c0_i32 = arith.constant 0 : i32
    return %arg0, %arg2 : i32, i32
  }
  func.func @transform_1(%arg0: i32, %arg1: i32, %arg2: i32) -> (i32, i32) {
    %c0_i32 = arith.constant 0 : i32
    return %arg2, %arg1 : i32, i32
  }
  func.func @transform_2(%arg0: i32, %arg1: i32, %arg2: i32) -> (i32, i32) {
    %c0_i32 = arith.constant 0 : i32
    %c0_i32_0 = arith.constant 0 : i32
    return %c0_i32, %arg1 : i32, i32
  }
  func.func @transform_3(%arg0: i32, %arg1: i32, %arg2: i32) -> (i32, i32) {
    %c0_i32 = arith.constant 0 : i32
    return %arg0, %arg1 : i32, i32
  }
}

module attributes {stable_mosaic.version = 11 : i64} {
  func.func @kernel(%arg0: i32, %arg1: memref<40x128xf32, #tpu.memory_space<vmem>>, %arg2: memref<40x128xf32, #tpu.memory_space<vmem>>, %arg3: memref<40x128xf32, #tpu.memory_space<vmem>>, %arg4: memref<1x128xf32, #tpu.memory_space<vmem>>, %arg5: memref<1x128xf32, #tpu.memory_space<vmem>>, %arg6: memref<1x128xf32, #tpu.memory_space<vmem>>, %arg7: memref<40x128xbf16, #tpu.memory_space<vmem>>, %arg8: memref<1x128xf32, #tpu.memory_space<vmem>>, %arg9: memref<1x1xf32, #tpu.memory_space<vmem>>) attributes {dimension_semantics = [#tpu.dimension_semantics<arbitrary>], iteration_bounds = array<i64: 1>, scalar_prefetch = 0 : i64, scratch_operands = 0 : i64, tpu.core_type = #tpu.core_type<tc>, window_params = [{transform_indices = @transform_0, window_bounds = array<i64: 40, 128>}, {transform_indices = @transform_1, window_bounds = array<i64: 40, 128>}, {transform_indices = @transform_2, window_bounds = array<i64: 40, 128>}, {transform_indices = @transform_3, window_bounds = array<i64: 1, 128>}, {transform_indices = @transform_4, window_bounds = array<i64: 1, 128>}, {transform_indices = @transform_5, window_bounds = array<i64: 1, 128>}, {transform_indices = @transform_6, window_bounds = array<i64: 40, 128>}, {transform_indices = @transform_7, window_bounds = array<i64: 1, 128>}, {pipeline_mode = #tpu.pipeline_mode<synchronous>, transform_indices = @transform_8, window_bounds = array<i64: 1, 1>}]} {
    %c0_i32 = arith.constant 0 : i32
    %0 = arith.cmpi eq, %arg0, %c0_i32 : i32
    %1 = arith.extui %0 : i1 to i32
    %c0_i32_0 = arith.constant 0 : i32
    %2 = arith.cmpi ne, %1, %c0_i32_0 : i32
    scf.if %2 {
      %cst_30 = arith.constant 0.000000e+00 : f32
      %70 = vector.broadcast %cst_30 : f32 to vector<1x1xf32>
      %c0_31 = arith.constant 0 : index
      %c0_32 = arith.constant 0 : index
      %71 = vector.load %arg9[%c0_31, %c0_32] : memref<1x1xf32, #tpu.memory_space<vmem>>, vector<1x1xf32>
      tpu.vector_store %arg9[%c0_31, %c0_32], %70 {strides = array<i32>} : memref<1x1xf32, #tpu.memory_space<vmem>>, vector<1x1xf32>,
    } else {
    }
    %c128_i32 = arith.constant 128 : i32
    %3 = arith.muli %arg0, %c128_i32 : i32
    %c0 = arith.constant 0 : index
    %c0_1 = arith.constant 0 : index
    %4 = vector.load %arg1[%c0, %c0_1] : memref<40x128xf32, #tpu.memory_space<vmem>>, vector<40x128xf32>
    %c0_2 = arith.constant 0 : index
    %c0_3 = arith.constant 0 : index
    %5 = vector.load %arg2[%c0_2, %c0_3] : memref<40x128xf32, #tpu.memory_space<vmem>>, vector<40x128xf32>
    %6 = math.exp %5 : vector<40x128xf32>
    %c0_4 = arith.constant 0 : index
    %c0_5 = arith.constant 0 : index
    %7 = vector.load %arg3[%c0_4, %c0_5] : memref<40x128xf32, #tpu.memory_space<vmem>>, vector<40x128xf32>
    %8 = arith.mulf %6, %7 : vector<40x128xf32>
    %9 = arith.addf %4, %8 : vector<40x128xf32>
    %10 = arith.truncf %9 : vector<40x128xf32> to vector<40x128xbf16>
    %c0_6 = arith.constant 0 : index
    %c0_7 = arith.constant 0 : index
    %11 = vector.load %arg7[%c0_6, %c0_7] : memref<40x128xbf16, #tpu.memory_space<vmem>>, vector<40x128xbf16>
    tpu.vector_store %arg7[%c0_6, %c0_7], %10 {strides = array<i32>} : memref<40x128xbf16, #tpu.memory_space<vmem>>, vector<40x128xbf16>,
    %cst = arith.constant -2.30258512 : f32
    %12 = vector.broadcast %cst : f32 to vector<40x128xf32>
    %13 = arith.subf %12, %5 : vector<40x128xf32>
    %14 = arith.mulf %6, %6 : vector<40x128xf32>
    %15 = arith.mulf %4, %4 : vector<40x128xf32>
    %16 = arith.addf %14, %15 : vector<40x128xf32>
    %cst_8 = arith.constant 5.000000e+01 : f32
    %17 = vector.broadcast %cst_8 : f32 to vector<40x128xf32>
    %18 = arith.mulf %16, %17 : vector<40x128xf32>
    %19 = arith.addf %13, %18 : vector<40x128xf32>
    %cst_9 = arith.constant 5.000000e-01 : f32
    %20 = vector.broadcast %cst_9 : f32 to vector<40x128xf32>
    %21 = arith.subf %19, %20 : vector<40x128xf32>
    %22 = tpu.iota {dimensions = array<i32: 0>} : vector<40x128xi32>
    %23 = tpu.iota {dimensions = array<i32: 1>} : vector<40x128xi32>
    %24 = vector.broadcast %3 : i32 to vector<40x128xi32>
    %25 = arith.addi %23, %24 : vector<40x128xi32>
    %c36_i32 = arith.constant 36 : i32
    %26 = vector.broadcast %c36_i32 : i32 to vector<40x128xi32>
    %27 = arith.cmpi slt, %22, %26 : vector<40x128xi32>
    %c8_i32 = arith.constant 8 : i32
    %28 = vector.broadcast %c8_i32 : i32 to vector<40x128xi32>
    %29 = arith.cmpi slt, %25, %28 : vector<40x128xi32>
    %30 = arith.andi %27, %29 : vector<40x128xi1>
    %cst_10 = arith.constant 0.000000e+00 : f32
    %31 = vector.broadcast %cst_10 : f32 to vector<40x128xf32>
    %32 = arith.select %30, %21, %31 : vector<40x128xi1>, vector<40x128xf32>
    %c0_11 = arith.constant 0 : index
    %c0_12 = arith.constant 0 : index
    %33 = vector.load %arg4[%c0_11, %c0_12] : memref<1x128xf32, #tpu.memory_space<vmem>>, vector<1x128xf32>
    %c0_13 = arith.constant 0 : index
    %c0_14 = arith.constant 0 : index
    %34 = vector.load %arg5[%c0_13, %c0_14] : memref<1x128xf32, #tpu.memory_space<vmem>>, vector<1x128xf32>
    %35 = math.exp %34 : vector<1x128xf32>
    %c0_15 = arith.constant 0 : index
    %c0_16 = arith.constant 0 : index
    %36 = vector.load %arg6[%c0_15, %c0_16] : memref<1x128xf32, #tpu.memory_space<vmem>>, vector<1x128xf32>
    %37 = arith.mulf %35, %36 : vector<1x128xf32>
    %38 = arith.addf %33, %37 : vector<1x128xf32>
    %c0_17 = arith.constant 0 : index
    %c0_18 = arith.constant 0 : index
    %39 = vector.load %arg8[%c0_17, %c0_18] : memref<1x128xf32, #tpu.memory_space<vmem>>, vector<1x128xf32>
    tpu.vector_store %arg8[%c0_17, %c0_18], %38 {strides = array<i32>} : memref<1x128xf32, #tpu.memory_space<vmem>>, vector<1x128xf32>,
    %cst_19 = arith.constant -2.30258512 : f32
    %40 = vector.broadcast %cst_19 : f32 to vector<1x128xf32>
    %41 = arith.subf %40, %34 : vector<1x128xf32>
    %42 = arith.mulf %35, %35 : vector<1x128xf32>
    %43 = arith.mulf %33, %33 : vector<1x128xf32>
    %44 = arith.addf %42, %43 : vector<1x128xf32>
    %cst_20 = arith.constant 5.000000e+01 : f32
    %45 = vector.broadcast %cst_20 : f32 to vector<1x128xf32>
    %46 = arith.mulf %44, %45 : vector<1x128xf32>
    %47 = arith.addf %41, %46 : vector<1x128xf32>
    %cst_21 = arith.constant 5.000000e-01 : f32
    %48 = vector.broadcast %cst_21 : f32 to vector<1x128xf32>
    %49 = arith.subf %47, %48 : vector<1x128xf32>
    %50 = tpu.iota {dimensions = array<i32: 1>} : vector<1x128xi32>
    %51 = vector.broadcast %3 : i32 to vector<1x128xi32>
    %52 = arith.addi %50, %51 : vector<1x128xi32>
    %c8_i32_22 = arith.constant 8 : i32
    %53 = vector.broadcast %c8_i32_22 : i32 to vector<1x128xi32>
    %54 = arith.cmpi slt, %52, %53 : vector<1x128xi32>
    %cst_23 = arith.constant 0.000000e+00 : f32
    %55 = vector.broadcast %cst_23 : f32 to vector<1x128xf32>
    %56 = arith.select %54, %49, %55 : vector<1x128xi1>, vector<1x128xf32>
    %c0_24 = arith.constant 0 : index
    %c0_25 = arith.constant 0 : index
    %57 = vector.load %arg9[%c0_24, %c0_25] : memref<1x1xf32, #tpu.memory_space<vmem>>, vector<1x1xf32>
    %58 = vector.shape_cast %32 : vector<40x128xf32> to vector<1x40x128xf32>
    %cst_26 = arith.constant dense<0.000000e+00> : vector<1xf32>
    %59 = vector.multi_reduction <add>, %58, %cst_26 [1, 2] : vector<1x40x128xf32> to vector<1xf32>
    %60 = vector.shape_cast %59 : vector<1xf32> to vector<1x1x1xf32>
    %61 = vector.extract %60[0, 0, 0] : f32 from vector<1x1x1xf32>
    %62 = vector.shape_cast %56 : vector<1x128xf32> to vector<1x1x128xf32>
    %cst_27 = arith.constant dense<0.000000e+00> : vector<1xf32>
    %63 = vector.multi_reduction <add>, %62, %cst_27 [1, 2] : vector<1x1x128xf32> to vector<1xf32>
    %64 = vector.shape_cast %63 : vector<1xf32> to vector<1x1x1xf32>
    %65 = vector.extract %64[0, 0, 0] : f32 from vector<1x1x1xf32>
    %66 = arith.addf %61, %65 : f32
    %67 = vector.broadcast %66 : f32 to vector<1x1xf32>
    %68 = arith.addf %57, %67 : vector<1x1xf32>
    %c0_28 = arith.constant 0 : index
    %c0_29 = arith.constant 0 : index
    %69 = vector.load %arg9[%c0_28, %c0_29] : memref<1x1xf32, #tpu.memory_space<vmem>>, vector<1x1xf32>
    tpu.vector_store %arg9[%c0_28, %c0_29], %68 {strides = array<i32>} : memref<1x1xf32, #tpu.memory_space<vmem>>, vector<1x1xf32>,
    return
  }
  func.func @transform_0(%arg0: i32) -> (i32, i32) {
    %c0_i32 = arith.constant 0 : i32
    %c0_i32_0 = arith.constant 0 : i32
    return %c0_i32, %arg0 : i32, i32
  }
  func.func @transform_1(%arg0: i32) -> (i32, i32) {
    %c0_i32 = arith.constant 0 : i32
    %c0_i32_0 = arith.constant 0 : i32
    return %c0_i32, %arg0 : i32, i32
  }
  func.func @transform_2(%arg0: i32) -> (i32, i32) {
    %c0_i32 = arith.constant 0 : i32
    %c0_i32_0 = arith.constant 0 : i32
    return %c0_i32, %arg0 : i32, i32
  }
  func.func @transform_3(%arg0: i32) -> (i32, i32) {
    %c0_i32 = arith.constant 0 : i32
    %c0_i32_0 = arith.constant 0 : i32
    return %c0_i32, %arg0 : i32, i32
  }
  func.func @transform_4(%arg0: i32) -> (i32, i32) {
    %c0_i32 = arith.constant 0 : i32
    %c0_i32_0 = arith.constant 0 : i32
    return %c0_i32, %arg0 : i32, i32
  }
  func.func @transform_5(%arg0: i32) -> (i32, i32) {
    %c0_i32 = arith.constant 0 : i32
    %c0_i32_0 = arith.constant 0 : i32
    return %c0_i32, %arg0 : i32, i32
  }
  func.func @transform_6(%arg0: i32) -> (i32, i32) {
    %c0_i32 = arith.constant 0 : i32
    %c0_i32_0 = arith.constant 0 : i32
    return %c0_i32, %arg0 : i32, i32
  }
  func.func @transform_7(%arg0: i32) -> (i32, i32) {
    %c0_i32 = arith.constant 0 : i32
    %c0_i32_0 = arith.constant 0 : i32
    return %c0_i32, %arg0 : i32, i32
  }
  func.func @transform_8(%arg0: i32) -> (i32, i32) {
    %c0_i32 = arith.constant 0 : i32
    %c0_i32_0 = arith.constant 0 : i32
    %c0_i32_1 = arith.constant 0 : i32
    return %c0_i32, %c0_i32_0 : i32, i32
  }
}

</mosaic_0001>

<bundles_post_ra>
// kernel: rand_conv2d_forward.2
= control target key start
LH: loop header
LB: loop body
LE: loop exit
PB: predicated region body
PF: predicated region fallthrough
CT: control target
= control target key end

     0   :  { %v130_v10 = vlaneseq  ;;  %s469_s0 = inlined_call_operand.vmem [shape: f32[40,128], index: 0, kind: input, shape index: {}]   ;;  %s470_s1 = inlined_call_operand.vmem [shape: f32[40,128], index: 1, kind: input, shape index: {}]   ;;  %s471_s2 = inlined_call_operand.vmem [shape: f32[40,128], index: 2, kind: input, shape index: {}]   ;;  %s472_s3 = inlined_call_operand.vmem [shape: f32[1,128], index: 3, kind: input, shape index: {}]   ;;  %s473_s4 = inlined_call_operand.vmem [shape: f32[1,128], index: 4, kind: input, shape index: {}]   ;;  %s474_s5 = inlined_call_operand.vmem [shape: f32[1,128], index: 5, kind: input, shape index: {}]   ;;  %s475_s6 = inlined_call_operand.vmem [shape: bf16[40,128], index: 6, kind: output, shape index: {0}]   ;;  %s476_s7 = inlined_call_operand.vmem [shape: f32[1,128], index: 7, kind: output, shape index: {1}]   ;;  %s477_s8 = inlined_call_operand.hbm [shape: f32[1,1], index: 8, kind: output, shape index: {2}]  }
   0x1   :  { %v343_v0 = vld [vmem:[%s470_s1] sm:$0xff]  ;;  %v348_v1 = vld [vmem:[%s470_s1 + $0x8] sm:$0xff]  ;;  %v353_v2 = vld [vmem:[%s470_s1 + $0x10] sm:$0xff] }
   0x2   :  { %v358_v3 = vld [vmem:[%s470_s1 + $0x18] sm:$0xff]  ;;  %v44_v4 = vmul.f32 1.442695, %v343_v0  ;;  %v364_v5 = vld [vmem:[%s470_s1 + $0x20] sm:$0xff]  ;;  %v46_v6 = vmul.f32 1.442695, %v348_v1 }
   0x3   :  { %v48_v7 = vmul.f32 1.442695, %v353_v2  ;;  %v50_v8 = vmul.f32 1.442695, %v358_v3  ;;  %v52_v9 = vmul.f32 1.442695, %v364_v5 }
   0x4   :  { %257 = vpow2.f32 %v44_v4  ;;  %v373_v11 = vld [vmem:[%s473_s4] sm:$0x1]  ;;  %v131_v12 = vshrl.u32 %v130_v10, 7 }
   0x5   :  { %259 = vpow2.f32 %v46_v6  ;;  %v158_v13 = vmul.f32 1.442695, %v373_v11  ;;  %v34_v14 = vld [vmem:[%s469_s0] sm:$0xff] }
   0x6   :  { %261 = vpow2.f32 %v48_v7 }
   0x7   :  { %263 = vpow2.f32 %v50_v8 }
   0x8   :  { %265 = vpow2.f32 %v52_v9 }
   0x9   :  { %14 = vsyncpa [#allocation3], 0  ;;  %v35_v15 = vld [vmem:[%s469_s0 + $0x8] sm:$0xff]  ;;  %v36_v16 = vld [vmem:[%s469_s0 + $0x10] sm:$0xff]  ;;  %267 = vpow2.f32 %v158_v13  ;;  %v105_v20 = vmul.f32 %v34_v14, %v34_v14  ;;  %v394_v21 = vadd.s32 32, %v131_v12  ;;  %v396_v22 = vand.u32 127, %v130_v10 }
   0xa   :  { %v37_v17 = vld [vmem:[%s469_s0 + $0x18] sm:$0xff]  ;;  %v38_v18 = vld [vmem:[%s469_s0 + $0x20] sm:$0xff]  ;;  %v55_v24 = vld [vmem:[%s471_s2 + $0x8] sm:$0xff]  ;;  %v95_v26 = vsub.f32 -2.3025851, %v343_v0  ;;  %v106_v27 = vmul.f32 %v35_v15, %v35_v15  ;;  %v107_v28 = vmul.f32 %v36_v16, %v36_v16  ;;  %vm186_vm3 = vcmask 1040384  }
   0xb   :  { %v54_v19 = vld [vmem:[%s471_s2] sm:$0xff]  ;;  %v56_v25 = vld [vmem:[%s471_s2 + $0x10] sm:$0xff]  ;;  %v108_v29 = vmul.f32 %v37_v17, %v37_v17  ;;  %v96_v31 = vsub.f32 -2.3025851, %v348_v1  ;;  %v97_v32 = vsub.f32 -2.3025851, %v353_v2  ;;  %v109_v34 = vmul.f32 %v38_v18, %v38_v18 }
   0xc   :  { %v401_v23 = vld [vmem:[%s472_s3] sm:$0x1]  ;;  %v98_v33 = vsub.f32 -2.3025851, %v358_v3  ;;  %v57_v36 = vld [vmem:[%s471_s2 + $0x18] sm:$0xff]  ;;  %vm144_vm0 = vcmp.lt.s32.totalorder %v394_v21, 36 }
   0xd   :  { %v99_v38 = vsub.f32 -2.3025851, %v364_v5  ;;  %v166_v40 = vmul.f32 %v401_v23, %v401_v23  ;;  %v58_v42 = vld [vmem:[%s471_s2 + $0x20] sm:$0xff]  ;;  %vm145_vm1 = vcmp.lt.s32.totalorder %v396_v22, 8  ;;  %vm31_vm4 = vcmask 0   ;;  %s294_s21 = smov [#allocation2]  }
   0xe   :  { %v258_v30 = vpop.eup %257  ;;  %v160_v63 = vld [vmem:[%s474_s5] sm:$0x1]  ;;  %vm150_vm2 = vmand %vm144_vm0, %vm145_vm1  ;;  %s212_s22 = sshll.u32 %s294_s21, 4  ;;  %s213_s22 = int_to_ptr.vmem [resolvable:$true] %s212_s22 }
   0xf   :  { %v260_v35 = vpop.eup %259  ;;  %v59_v37 = vmul.f32 %v258_v30, %v54_v19  ;;  %v100_v39 = vmul.f32 %v258_v30, %v258_v30  ;;  %s269_s4 = scalar_lea.vmem %s213_s22, 16  ;;  %s273_s23 = scalar_lea.vmem %s213_s22, 32 }
  0x10   :  { %v262_v41 = vpop.eup %261  ;;  %v60_v43 = vmul.f32 %v260_v35, %v55_v24  ;;  %v101_v44 = vmul.f32 %v260_v35, %v260_v35  ;;  %v164_v24 = vsub.f32 -2.3025851, %v373_v11  ;;  %p270_p0 = scmp.ne.s32.totalorder %s213_s22, %s269_s4  ;;  %p274_p1 = scmp.lt.s32.totalorder %s213_s22, %s213_s22 }
  0x11   :  { %v264_v45 = vpop.eup %263  ;;  %v61_v46 = vmul.f32 %v262_v41, %v56_v25  ;;  %v102_v47 = vmul.f32 %v262_v41, %v262_v41  ;;  %v110_v48 = vadd.f32 %v105_v20, %v100_v39  ;;  %v64_v49 = vadd.f32 %v59_v37, %v34_v14  ;;  %p275_p2 = scmp.lt.s32.totalorder %s273_s23, %s269_s4 }
  0x12   :  { %v266_v50 = vpop.eup %265  ;;  %v62_v51 = vmul.f32 %v264_v45, %v57_v36  ;;  %v65_v52 = vadd.f32 %v60_v43, %v35_v15  ;;  %v103_v53 = vmul.f32 %v264_v45, %v264_v45  ;;  %v111_v54 = vadd.f32 %v106_v27, %v101_v44 }
  0x13   :  { %v63_v55 = vmul.f32 %v266_v50, %v58_v42  ;;  %v66_v56 = vadd.f32 %v61_v46, %v36_v16  ;;  %v104_v57 = vmul.f32 %v266_v50, %v266_v50  ;;  %v112_v58 = vadd.f32 %v107_v28, %v102_v47  ;;  %v268_v0 = vpop.eup %267  ;;  %p276_p3 = por %p275_p2, %p274_p1 }
  0x14   :  { %v67_v59 = vadd.f32 %v62_v51, %v37_v17  ;;  %v113_v60 = vadd.f32 %v108_v29, %v103_v53  ;;  %v115_v61 = vmul.f32 50.0, %v110_v48  ;;  %v116_v62 = vmul.f32 50.0, %v111_v54 }
  0x15   :  { %v68_v1 = vadd.f32 %v63_v55, %v38_v18  ;;  %v114_v2 = vadd.f32 %v109_v34, %v104_v57  ;;  %v117_v3 = vmul.f32 50.0, %v112_v58  ;;  %v243_v4 = vpack.c.bf16 %v65_v52, %v64_v49  ;;  %p277_p4 = pnand %p276_p3, %p270_p0 }
  0x16   :  { %v248_v5 = vpack.c.bf16 %v67_v59, %v66_v56  ;;  %v118_v6 = vmul.f32 50.0, %v113_v60  ;;  %v120_v7 = vadd.f32 %v115_v61, %v95_v26  ;;  %v121_v8 = vadd.f32 %v116_v62, %v96_v31 }
  0x17   :  { %v239_v9 = vpack.c.bf16 %v68_v1, %v68_v1  ;;  %v119_v10 = vmul.f32 50.0, %v114_v2  ;;  %v122_v12 = vadd.f32 %v117_v3, %v97_v32  ;;  %244 = vst [vmem:[%s475_s6] sm:$0xff] %v243_v4   ;;  %v161_v13 = vmul.f32 %v268_v0, %v160_v63 }
  0x18   :  { %250 = vst [vmem:[%s475_s6 + $0x8] sm:$0xff] %v248_v5   ;;  %v123_v14 = vadd.f32 %v118_v6, %v98_v33  ;;  %v229_v15 = vadd.f32 -0.5, %v120_v7  ;;  %v230_v16 = vadd.f32 -0.5, %v121_v8  ;;  %v165_v17 = vmul.f32 %v268_v0, %v268_v0 }
  0x19   :  { %94 = vst [vmem:[%s475_s6 + $0x10] sm:$0xf] %v239_v9  ;;  %v124_v18 = vadd.f32 %v119_v10, %v99_v38  ;;  %v231_v19 = vadd.f32 -0.5, %v122_v12  ;;  %v162_v20 = vadd.f32 %v161_v13, %v401_v23  ;;  %v293_v39 = vmov 0.0  }
  0x1a   :  { %v232_v25 = vadd.f32 -0.5, %v123_v14  ;;  %v151_v26 = vsel %vm145_vm1, %v229_v15, 0.0  ;;  %v152_v27 = vsel %vm145_vm1, %v230_v16, 0.0  ;;  %v167_v28 = vadd.f32 %v166_v40, %v165_v17  ;;  %32 = vst.msk [vmem:[#allocation2] sm:$0x1] %vm31_vm4, %v293_v39 }
  0x1b   :  { %v233_v29 = vadd.f32 -0.5, %v124_v18  ;;  %v153_v30 = vsel %vm145_vm1, %v231_v19, 0.0  ;;  %v173_v23 = vadd.f32 %v152_v27, %v151_v26  ;;  %163 = vst [vmem:[%s476_s7] sm:$0x1] %v162_v20 }
  0x1c   :  { %v154_v11 = vsel %vm145_vm1, %v232_v25, 0.0  ;;  %v168_v31 = vmul.f32 50.0, %v167_v28 }
  0x1d   :  { %v174_v32 = vadd.f32 %v173_v23, %v153_v30  ;;  %v155_v33 = vsel %vm150_vm2, %v233_v29, 0.0 }
  0x1e   :  { %v169_v34 = vadd.f32 %v168_v31, %v164_v24 }
  0x1f   :  { %v175_v35 = vadd.f32 %v174_v32, %v154_v11 }
  0x20   :  { %v234_v36 = vadd.f32 -0.5, %v169_v34 }
  0x21   :  { %v176_v37 = vadd.f32 %v175_v35, %v155_v33  ;;  %v172_v53 = vld [vmem:[#allocation2] sm:$0x1] }
  0x22   :  { %v171_v21 = vsel %vm145_vm1, %v234_v36, 0.0 }
  0x23   :  { %177 = vadd.xlane.f32.xlu0 %v176_v37  ;;  %v187_v38 = vsel %vm186_vm3, %v171_v21, 0.0 }
  0x27   :  { %188 = vadd.xlane.f32.xlu0 %v187_v38 }
  0xb0   :  { %v178_v40 = vpop.xlane.xlu0 %177 }
  0xb1   :  { %v179_v41 = vrot.slane %v178_v40, 4 }
  0xb3   :  { %v180_v42 = vadd.f32 %v179_v41, %v178_v40 }
  0xb4   :  { %v189_v43 = vpop.xlane.xlu0 %188 }
  0xb5   :  { %v181_v44 = vrot.slane %v180_v42, 2  ;;  %v190_v45 = vrot.slane %v189_v43, 4 }
  0xb7   :  { %v191_v46 = vadd.f32 %v190_v45, %v189_v43  ;;  %v182_v47 = vadd.f32 %v181_v44, %v180_v42 }
  0xb9   :  { %v192_v48 = vrot.slane %v191_v46, 2  ;;  %v183_v49 = vrot.slane %v182_v47, 1 }
  0xbb   :  { %v193_v50 = vadd.f32 %v192_v48, %v191_v46  ;;  %v184_v22 = vadd.f32 %v183_v49, %v182_v47 }
  0xbd   :  { %251 = vpush %v184_v22  ;;  %v194_v51 = vrot.slane %v193_v50, 1 }
  0xbf   :  { %v195_v52 = vadd.f32 %v194_v51, %v193_v50 }
  0xc1   :  { %253 = vpush %v195_v52 }
  0xee   :  { %s252_s7 = spop %251 }
  0xf2   :  { %s254_s19 = spop %253 }
  0xf3   :  { %s197_s20 = sadd.f32 %s254_s19, %s252_s7 }
  0xf5   :  { %v198_v54 = vstv %s197_s20 }
  0xf6   :  { %v199_v55 = vadd.f32 %v198_v54, %v172_v53 }
  0xf8   :  { %201 = vst.msk [vmem:[#allocation2] sm:$0x1] %vm31_vm4, %v199_v55 }
  0xf9   :  { %280 = shalt.err (!%p277_p4)
}
  0xfa   :  { %s281_s26 = scalar_lea.hbm %s477_s8, 16 }
  0xfb   :  { %p282_p5 = scmp.ne.s32.totalorder %s477_s8, %s281_s26  ;;  %p285_p6 = scmp.lt.u32.totalorder %s281_s26, %s477_s8 }
  0xfd   :  { %p287_p7 = pnand %p285_p6, %p282_p5 }
  0xff   :  { %290 = shalt.err (!%p287_p7)
}
 0x100   :  { %215 = dma.vmem_to_hbm [thread:$0]  %s213_s22, 16, %s477_s8, [#allocation3]  }
 0x101   :  { %291 = dma.done.wait [#allocation3], 16  }
 0x102   :  { %292 = vsyncadd [#allocation3], 4294967280 }
 0x103   :  { %223 = vsyncpa [#allocation3], 1 }

// kernel: rand_conv2d_forward.3
= control target key start
LH: loop header
LB: loop body
LE: loop exit
PB: predicated region body
PF: predicated region fallthrough
CT: control target
= control target key end

     0   :  { %vm266_vm0 = vcmask 326656   ;;  %vm363_vm1 = vcmask 1043456   ;;  %s1358_s1 = inlined_call_operand.vmem [shape: bf16[40,128], index: 1, kind: input, shape index: {}]   ;;  %s1359_s0 = inlined_call_operand.vmem [shape: bf16[512,40], index: 0, kind: input, shape index: {}]   ;;  %s1360_s2 = inlined_call_operand.vmem [shape: f32[1,128], index: 2, kind: input, shape index: {}]   ;;  %s1361_s3 = inlined_call_operand.vmem [shape: f32[512,128], index: 3, kind: output, shape index: {}]  }
   0x1   :  { %v905_v0 = vld [vmem:[%s1358_s1] sm:$0xff]   ;;  %v906_v1 = vld [vmem:[%s1358_s1 + $0x8] sm:$0xff]   ;;  %v907_v2 = vld [vmem:[%s1358_s1 + $0x10] ss:$0 sps:$4 sm:$0xff]  }
   0x2   :  { %827 = vmatprep.subr.bf16.mxu0 %v905_v0  ;;  %897 = vmatprep.subr.bf16.mxu1 %v905_v0  ;;  %v908_v3 = vld [vmem:[%s1359_s0] sm:$0xff]   ;;  %v365_v5 = vsel %vm363_vm1, %v907_v2, 0  ;;  %v910_v6 = vld [vmem:[%s1359_s0 + $0x8] sm:$0xff]   ;;  %v912_v8 = vld [vmem:[%s1359_s0 + $0x10] sm:$0xff]  }
   0x3   :  { %828 = vmatpush3.bf16.msra.mxu0 %v905_v0  ;;  %900 = vmatpush3.bf16.msra.mxu1 %v905_v0  ;;  %v909_v4 = vld [vmem:[%s1359_s0 + $0x80] sm:$0xff]   ;;  %v911_v7 = vld [vmem:[%s1359_s0 + $0x88] sm:$0xff]   ;;  %v913_v9 = vld [vmem:[%s1359_s0 + $0x90] sm:$0xff]  }
   0x4   :  { %829 = vmatprep.subr.bf16.mxu0 %v906_v1  ;;  %898 = vmatprep.subr.bf16.mxu1 %v906_v1  ;;  %v914_v10 = vld [vmem:[%s1359_s0 + $0x18] sm:$0xff]   ;;  %v916_v12 = vld [vmem:[%s1359_s0 + $0x20] sm:$0xff]   ;;  %v918_v14 = vld [vmem:[%s1359_s0 + $0x28] sm:$0xff]  }
   0x5   :  { %833 = vmatprep.mubr.msk.bf16.mxu0 %vm266_vm0, %v908_v3  ;;  %865 = vmatprep.mubr.msk.bf16.mxu1 %vm266_vm0, %v909_v4  ;;  %v915_v11 = vld [vmem:[%s1359_s0 + $0x98] sm:$0xff]   ;;  %v917_v13 = vld [vmem:[%s1359_s0 + $0xa0] sm:$0xff]   ;;  %v919_v15 = vld [vmem:[%s1359_s0 + $0xa8] sm:$0xff]  }
   0x6   :  { %v920_v16 = vld [vmem:[%s1359_s0 + $0x30] sm:$0xff]   ;;  %v922_v18 = vld [vmem:[%s1359_s0 + $0x38] sm:$0xff]   ;;  %v924_v20 = vld [vmem:[%s1359_s0 + $0x40] sm:$0xff]  }
   0x7   :  { %830 = vmatpush3.bf16.msra.mxu0 %v906_v1  ;;  %901 = vmatpush3.bf16.msra.mxu1 %v906_v1  ;;  %v921_v17 = vld [vmem:[%s1359_s0 + $0xb0] sm:$0xff]   ;;  %v923_v19 = vld [vmem:[%s1359_s0 + $0xb8] sm:$0xff]   ;;  %v925_v21 = vld [vmem:[%s1359_s0 + $0xc0] sm:$0xff]  }
   0x8   :  { %903 = vmatprep.subr.msk.bf16.mxu0 %vm363_vm1, %v907_v2  ;;  %904 = vmatprep.subr.msk.bf16.mxu1 %vm363_vm1, %v907_v2  ;;  %v926_v22 = vld [vmem:[%s1359_s0 + $0x48] sm:$0xff]   ;;  %v928_v24 = vld [vmem:[%s1359_s0 + $0x50] sm:$0xff]   ;;  %v930_v26 = vld [vmem:[%s1359_s0 + $0x58] sm:$0xff]  }
   0x9   :  { %v927_v23 = vld [vmem:[%s1359_s0 + $0xc8] sm:$0xff]   ;;  %v929_v25 = vld [vmem:[%s1359_s0 + $0xd0] sm:$0xff]   ;;  %v931_v27 = vld [vmem:[%s1359_s0 + $0xd8] sm:$0xff]  }
   0xa   :  { %v932_v28 = vld [vmem:[%s1359_s0 + $0x60] sm:$0xff]   ;;  %v934_v30 = vld [vmem:[%s1359_s0 + $0x68] sm:$0xff]   ;;  %v936_v32 = vld [vmem:[%s1359_s0 + $0x70] sm:$0xff]  }
   0xb   :  { %832 = vmatpush3.bf16.msra.mxu0 %v365_v5  ;;  %902 = vmatpush3.bf16.msra.mxu1 %v365_v5  ;;  %v933_v29 = vld [vmem:[%s1359_s0 + $0xe0] sm:$0xff]   ;;  %v935_v31 = vld [vmem:[%s1359_s0 + $0xe8] sm:$0xff]   ;;  %v937_v33 = vld [vmem:[%s1359_s0 + $0xf0] sm:$0xff]  }
   0xc   :  { %v938_v34 = vld [vmem:[%s1359_s0 + $0x78] sm:$0xff]   ;;  %v1100_v36 = vld [vmem:[%s1360_s2] ss:$0 sm:$0xff] }
   0xd   :  { %v939_v35 = vld [vmem:[%s1359_s0 + $0xf8] sm:$0xff]  }
   0xe   :  { %834 = vmatmul.mubr.msk.bf16.vlgmr.msra.gmra.mrb[0].mxu0 %vm266_vm0, %v910_v6  ;;  %866 = vmatmul.mubr.msk.bf16.vlgmr.msra.gmra.mrb[0].mxu1 %vm266_vm0, %v911_v7 }
   0xf   :  { %837 = vmatprep.mubr.msk.bf16.mxu0 %vm266_vm0, %v912_v8  ;;  %869 = vmatprep.mubr.msk.bf16.mxu1 %vm266_vm0, %v913_v9 }
  0x16   :  { %838 = vmatmul.mubr.msk.bf16.gmra.mrb[4].mxu0 %vm266_vm0, %v914_v10  ;;  %870 = vmatmul.mubr.msk.bf16.gmra.mrb[4].mxu1 %vm266_vm0, %v915_v11 }
  0x17   :  { %841 = vmatprep.mubr.msk.bf16.mxu0 %vm266_vm0, %v916_v12  ;;  %873 = vmatprep.mubr.msk.bf16.mxu1 %vm266_vm0, %v917_v13 }
  0x1e   :  { %842 = vmatmul.mubr.msk.bf16.gmra.mrb[8].mxu0 %vm266_vm0, %v918_v14  ;;  %874 = vmatmul.mubr.msk.bf16.gmra.mrb[8].mxu1 %vm266_vm0, %v919_v15 }
  0x1f   :  { %845 = vmatprep.mubr.msk.bf16.mxu0 %vm266_vm0, %v920_v16  ;;  %877 = vmatprep.mubr.msk.bf16.mxu1 %vm266_vm0, %v921_v17 }
  0x26   :  { %846 = vmatmul.mubr.msk.bf16.gmra.mrb[12].mxu0 %vm266_vm0, %v922_v18  ;;  %878 = vmatmul.mubr.msk.bf16.gmra.mrb[12].mxu1 %vm266_vm0, %v923_v19 }
  0x27   :  { %849 = vmatprep.mubr.msk.bf16.mxu0 %vm266_vm0, %v924_v20  ;;  %881 = vmatprep.mubr.msk.bf16.mxu1 %vm266_vm0, %v925_v21 }
  0x2e   :  { %850 = vmatmul.mubr.msk.bf16.gmra.mrb[16].mxu0 %vm266_vm0, %v926_v22  ;;  %882 = vmatmul.mubr.msk.bf16.gmra.mrb[16].mxu1 %vm266_vm0, %v927_v23 }
  0x2f   :  { %853 = vmatprep.mubr.msk.bf16.mxu0 %vm266_vm0, %v928_v24  ;;  %885 = vmatprep.mubr.msk.bf16.mxu1 %vm266_vm0, %v929_v25 }
  0x36   :  { %854 = vmatmul.mubr.msk.bf16.gmra.mrb[20].mxu0 %vm266_vm0, %v930_v26  ;;  %886 = vmatmul.mubr.msk.bf16.gmra.mrb[20].mxu1 %vm266_vm0, %v931_v27 }
  0x37   :  { %857 = vmatprep.mubr.msk.bf16.mxu0 %vm266_vm0, %v932_v28  ;;  %889 = vmatprep.mubr.msk.bf16.mxu1 %vm266_vm0, %v933_v29 }
  0x3e   :  { %858 = vmatmul.mubr.msk.bf16.gmra.mrb[24].mxu0 %vm266_vm0, %v934_v30  ;;  %890 = vmatmul.mubr.msk.bf16.gmra.mrb[24].mxu1 %vm266_vm0, %v935_v31 }
  0x3f   :  { %861 = vmatprep.mubr.msk.bf16.mxu0 %vm266_vm0, %v936_v32  ;;  %893 = vmatprep.mubr.msk.bf16.mxu1 %vm266_vm0, %v937_v33 }
  0x46   :  { %862 = vmatmul.mubr.msk.bf16.gmra.mrb[28].mxu0 %vm266_vm0, %v938_v34  ;;  %894 = vmatmul.mubr.msk.bf16.gmra.mrb[28].mxu1 %vm266_vm0, %v939_v35 }
  0xe1   :  { %v835_v37 = vpop.f32.mrb[0].mxu0  ;;  %v867_v38 = vpop.f32.mrb[0].mxu1 }
  0xe2   :  { %v410_v39 = vadd.f32 %v835_v37, %v1100_v36  ;;  %v538_v40 = vadd.f32 %v867_v38, %v1100_v36  ;;  %v401_v41 = vpop.f32.mrb[1].mxu0  ;;  %v529_v42 = vpop.f32.mrb[1].mxu1 }
  0xe3   :  { %v402_v43 = vadd.f32 %v1100_v36, %v401_v41  ;;  %v530_v44 = vadd.f32 %v1100_v36, %v529_v42  ;;  %v836_v45 = vpop.f32.mrb[2].mxu0  ;;  %v868_v46 = vpop.f32.mrb[2].mxu1 }
  0xe4   :  { %658 = vst [vmem:[%s1361_s3 + $0x10] sm:$0xff] %v410_v39  ;;  %690 = vst [vmem:[%s1361_s3 + $0x110] sm:$0xff] %v538_v40  ;;  %v413_v47 = vadd.f32 %v836_v45, %v1100_v36  ;;  %v541_v48 = vadd.f32 %v868_v46, %v1100_v36  ;;  %v404_v49 = vpop.f32.mrb[3].mxu0  ;;  %v532_v50 = vpop.f32.mrb[3].mxu1 }
  0xe5   :  { %656 = vst [vmem:[%s1361_s3] sm:$0xff] %v402_v43  ;;  %688 = vst [vmem:[%s1361_s3 + $0x100] sm:$0xff] %v530_v44  ;;  %v405_v51 = vadd.f32 %v1100_v36, %v404_v49  ;;  %v533_v52 = vadd.f32 %v1100_v36, %v532_v50 }
  0xe6   :  { %659 = vst [vmem:[%s1361_s3 + $0x18] sm:$0xff] %v413_v47  ;;  %691 = vst [vmem:[%s1361_s3 + $0x118] sm:$0xff] %v541_v48 }
  0xe7   :  { %657 = vst [vmem:[%s1361_s3 + $0x8] sm:$0xff] %v405_v51  ;;  %689 = vst [vmem:[%s1361_s3 + $0x108] sm:$0xff] %v533_v52 }
  0xe9   :  { %v839_v53 = vpop.f32.mrb[4].mxu0  ;;  %v871_v54 = vpop.f32.mrb[4].mxu1 }
  0xea   :  { %v426_v55 = vadd.f32 %v839_v53, %v1100_v36  ;;  %v554_v56 = vadd.f32 %v871_v54, %v1100_v36  ;;  %v417_v57 = vpop.f32.mrb[5].mxu0  ;;  %v545_v58 = vpop.f32.mrb[5].mxu1 }
  0xeb   :  { %v418_v59 = vadd.f32 %v1100_v36, %v417_v57  ;;  %v546_v60 = vadd.f32 %v1100_v36, %v545_v58  ;;  %v840_v61 = vpop.f32.mrb[6].mxu0  ;;  %v872_v62 = vpop.f32.mrb[6].mxu1 }
  0xec   :  { %662 = vst [vmem:[%s1361_s3 + $0x30] sm:$0xff] %v426_v55  ;;  %694 = vst [vmem:[%s1361_s3 + $0x130] sm:$0xff] %v554_v56  ;;  %v429_v63 = vadd.f32 %v840_v61, %v1100_v36  ;;  %v557_v0 = vadd.f32 %v872_v62, %v1100_v36  ;;  %v420_v1 = vpop.f32.mrb[7].mxu0  ;;  %v548_v2 = vpop.f32.mrb[7].mxu1 }
  0xed   :  { %660 = vst [vmem:[%s1361_s3 + $0x20] sm:$0xff] %v418_v59  ;;  %692 = vst [vmem:[%s1361_s3 + $0x120] sm:$0xff] %v546_v60  ;;  %v421_v3 = vadd.f32 %v1100_v36, %v420_v1  ;;  %v549_v4 = vadd.f32 %v1100_v36, %v548_v2 }
  0xee   :  { %663 = vst [vmem:[%s1361_s3 + $0x38] sm:$0xff] %v429_v63  ;;  %695 = vst [vmem:[%s1361_s3 + $0x138] sm:$0xff] %v557_v0 }
  0xef   :  { %661 = vst [vmem:[%s1361_s3 + $0x28] sm:$0xff] %v421_v3  ;;  %693 = vst [vmem:[%s1361_s3 + $0x128] sm:$0xff] %v549_v4 }
  0xf1   :  { %v843_v5 = vpop.f32.mrb[8].mxu0  ;;  %v875_v6 = vpop.f32.mrb[8].mxu1 }
  0xf2   :  { %v442_v7 = vadd.f32 %v843_v5, %v1100_v36  ;;  %v570_v8 = vadd.f32 %v875_v6, %v1100_v36  ;;  %v433_v9 = vpop.f32.mrb[9].mxu0  ;;  %v561_v10 = vpop.f32.mrb[9].mxu1 }
  0xf3   :  { %v434_v11 = vadd.f32 %v1100_v36, %v433_v9  ;;  %v562_v12 = vadd.f32 %v1100_v36, %v561_v10  ;;  %v844_v13 = vpop.f32.mrb[10].mxu0  ;;  %v876_v14 = vpop.f32.mrb[10].mxu1 }
  0xf4   :  { %666 = vst [vmem:[%s1361_s3 + $0x50] sm:$0xff] %v442_v7  ;;  %698 = vst [vmem:[%s1361_s3 + $0x150] sm:$0xff] %v570_v8  ;;  %v445_v15 = vadd.f32 %v844_v13, %v1100_v36  ;;  %v573_v16 = vadd.f32 %v876_v14, %v1100_v36  ;;  %v436_v17 = vpop.f32.mrb[11].mxu0  ;;  %v564_v18 = vpop.f32.mrb[11].mxu1 }
  0xf5   :  { %664 = vst [vmem:[%s1361_s3 + $0x40] sm:$0xff] %v434_v11  ;;  %696 = vst [vmem:[%s1361_s3 + $0x140] sm:$0xff] %v562_v12  ;;  %v437_v19 = vadd.f32 %v1100_v36, %v436_v17  ;;  %v565_v20 = vadd.f32 %v1100_v36, %v564_v18 }
  0xf6   :  { %667 = vst [vmem:[%s1361_s3 + $0x58] sm:$0xff] %v445_v15  ;;  %699 = vst [vmem:[%s1361_s3 + $0x158] sm:$0xff] %v573_v16 }
  0xf7   :  { %665 = vst [vmem:[%s1361_s3 + $0x48] sm:$0xff] %v437_v19  ;;  %697 = vst [vmem:[%s1361_s3 + $0x148] sm:$0xff] %v565_v20 }
  0xf9   :  { %v847_v21 = vpop.f32.mrb[12].mxu0  ;;  %v879_v22 = vpop.f32.mrb[12].mxu1 }
  0xfa   :  { %v458_v23 = vadd.f32 %v847_v21, %v1100_v36  ;;  %v586_v24 = vadd.f32 %v879_v22, %v1100_v36  ;;  %v449_v25 = vpop.f32.mrb[13].mxu0  ;;  %v577_v26 = vpop.f32.mrb[13].mxu1 }
  0xfb   :  { %v450_v27 = vadd.f32 %v1100_v36, %v449_v25  ;;  %v578_v28 = vadd.f32 %v1100_v36, %v577_v26  ;;  %v848_v29 = vpop.f32.mrb[14].mxu0  ;;  %v880_v30 = vpop.f32.mrb[14].mxu1 }
  0xfc   :  { %670 = vst [vmem:[%s1361_s3 + $0x70] sm:$0xff] %v458_v23  ;;  %702 = vst [vmem:[%s1361_s3 + $0x170] sm:$0xff] %v586_v24  ;;  %v461_v31 = vadd.f32 %v848_v29, %v1100_v36  ;;  %v589_v32 = vadd.f32 %v880_v30, %v1100_v36  ;;  %v452_v33 = vpop.f32.mrb[15].mxu0  ;;  %v580_v34 = vpop.f32.mrb[15].mxu1 }
  0xfd   :  { %668 = vst [vmem:[%s1361_s3 + $0x60] sm:$0xff] %v450_v27  ;;  %700 = vst [vmem:[%s1361_s3 + $0x160] sm:$0xff] %v578_v28  ;;  %v453_v35 = vadd.f32 %v1100_v36, %v452_v33  ;;  %v581_v37 = vadd.f32 %v1100_v36, %v580_v34 }
  0xfe   :  { %671 = vst [vmem:[%s1361_s3 + $0x78] sm:$0xff] %v461_v31  ;;  %703 = vst [vmem:[%s1361_s3 + $0x178] sm:$0xff] %v589_v32 }
  0xff   :  { %669 = vst [vmem:[%s1361_s3 + $0x68] sm:$0xff] %v453_v35  ;;  %701 = vst [vmem:[%s1361_s3 + $0x168] sm:$0xff] %v581_v37 }
 0x101   :  { %v851_v38 = vpop.f32.mrb[16].mxu0  ;;  %v883_v39 = vpop.f32.mrb[16].mxu1 }
 0x102   :  { %v474_v40 = vadd.f32 %v851_v38, %v1100_v36  ;;  %v602_v41 = vadd.f32 %v883_v39, %v1100_v36  ;;  %v465_v42 = vpop.f32.mrb[17].mxu0  ;;  %v593_v43 = vpop.f32.mrb[17].mxu1 }
 0x103   :  { %v466_v44 = vadd.f32 %v1100_v36, %v465_v42  ;;  %v594_v45 = vadd.f32 %v1100_v36, %v593_v43  ;;  %v852_v46 = vpop.f32.mrb[18].mxu0  ;;  %v884_v47 = vpop.f32.mrb[18].mxu1 }
 0x104   :  { %674 = vst [vmem:[%s1361_s3 + $0x90] sm:$0xff] %v474_v40  ;;  %706 = vst [vmem:[%s1361_s3 + $0x190] sm:$0xff] %v602_v41  ;;  %v477_v48 = vadd.f32 %v852_v46, %v1100_v36  ;;  %v605_v49 = vadd.f32 %v884_v47, %v1100_v36  ;;  %v468_v50 = vpop.f32.mrb[19].mxu0  ;;  %v596_v51 = vpop.f32.mrb[19].mxu1 }
 0x105   :  { %672 = vst [vmem:[%s1361_s3 + $0x80] sm:$0xff] %v466_v44  ;;  %704 = vst [vmem:[%s1361_s3 + $0x180] sm:$0xff] %v594_v45  ;;  %v469_v52 = vadd.f32 %v1100_v36, %v468_v50  ;;  %v597_v53 = vadd.f32 %v1100_v36, %v596_v51 }
 0x106   :  { %675 = vst [vmem:[%s1361_s3 + $0x98] sm:$0xff] %v477_v48  ;;  %707 = vst [vmem:[%s1361_s3 + $0x198] sm:$0xff] %v605_v49 }
 0x107   :  { %673 = vst [vmem:[%s1361_s3 + $0x88] sm:$0xff] %v469_v52  ;;  %705 = vst [vmem:[%s1361_s3 + $0x188] sm:$0xff] %v597_v53 }
 0x109   :  { %v855_v54 = vpop.f32.mrb[20].mxu0  ;;  %v887_v55 = vpop.f32.mrb[20].mxu1 }
 0x10a   :  { %v490_v56 = vadd.f32 %v855_v54, %v1100_v36  ;;  %v618_v57 = vadd.f32 %v887_v55, %v1100_v36  ;;  %v481_v58 = vpop.f32.mrb[21].mxu0  ;;  %v609_v59 = vpop.f32.mrb[21].mxu1 }
 0x10b   :  { %v482_v60 = vadd.f32 %v1100_v36, %v481_v58  ;;  %v610_v61 = vadd.f32 %v1100_v36, %v609_v59  ;;  %v856_v62 = vpop.f32.mrb[22].mxu0  ;;  %v888_v63 = vpop.f32.mrb[22].mxu1 }
 0x10c   :  { %678 = vst [vmem:[%s1361_s3 + $0xb0] sm:$0xff] %v490_v56  ;;  %710 = vst [vmem:[%s1361_s3 + $0x1b0] sm:$0xff] %v618_v57  ;;  %v493_v0 = vadd.f32 %v856_v62, %v1100_v36  ;;  %v621_v1 = vadd.f32 %v888_v63, %v1100_v36  ;;  %v484_v2 = vpop.f32.mrb[23].mxu0  ;;  %v612_v3 = vpop.f32.mrb[23].mxu1 }
 0x10d   :  { %676 = vst [vmem:[%s1361_s3 + $0xa0] sm:$0xff] %v482_v60  ;;  %708 = vst [vmem:[%s1361_s3 + $0x1a0] sm:$0xff] %v610_v61  ;;  %v485_v4 = vadd.f32 %v1100_v36, %v484_v2  ;;  %v613_v5 = vadd.f32 %v1100_v36, %v612_v3 }
 0x10e   :  { %679 = vst [vmem:[%s1361_s3 + $0xb8] sm:$0xff] %v493_v0  ;;  %711 = vst [vmem:[%s1361_s3 + $0x1b8] sm:$0xff] %v621_v1 }
 0x10f   :  { %677 = vst [vmem:[%s1361_s3 + $0xa8] sm:$0xff] %v485_v4  ;;  %709 = vst [vmem:[%s1361_s3 + $0x1a8] sm:$0xff] %v613_v5 }
 0x111   :  { %v859_v6 = vpop.f32.mrb[24].mxu0  ;;  %v891_v7 = vpop.f32.mrb[24].mxu1 }
 0x112   :  { %v506_v8 = vadd.f32 %v859_v6, %v1100_v36  ;;  %v634_v9 = vadd.f32 %v891_v7, %v1100_v36  ;;  %v497_v10 = vpop.f32.mrb[25].mxu0  ;;  %v625_v11 = vpop.f32.mrb[25].mxu1 }
 0x113   :  { %v498_v12 = vadd.f32 %v1100_v36, %v497_v10  ;;  %v626_v13 = vadd.f32 %v1100_v36, %v625_v11  ;;  %v860_v14 = vpop.f32.mrb[26].mxu0  ;;  %v892_v15 = vpop.f32.mrb[26].mxu1 }
 0x114   :  { %682 = vst [vmem:[%s1361_s3 + $0xd0] sm:$0xff] %v506_v8  ;;  %714 = vst [vmem:[%s1361_s3 + $0x1d0] sm:$0xff] %v634_v9  ;;  %v509_v16 = vadd.f32 %v860_v14, %v1100_v36  ;;  %v637_v17 = vadd.f32 %v892_v15, %v1100_v36  ;;  %v500_v18 = vpop.f32.mrb[27].mxu0  ;;  %v628_v19 = vpop.f32.mrb[27].mxu1 }
 0x115   :  { %680 = vst [vmem:[%s1361_s3 + $0xc0] sm:$0xff] %v498_v12  ;;  %712 = vst [vmem:[%s1361_s3 + $0x1c0] sm:$0xff] %v626_v13  ;;  %v501_v20 = vadd.f32 %v1100_v36, %v500_v18  ;;  %v629_v21 = vadd.f32 %v1100_v36, %v628_v19 }
 0x116   :  { %683 = vst [vmem:[%s1361_s3 + $0xd8] sm:$0xff] %v509_v16  ;;  %715 = vst [vmem:[%s1361_s3 + $0x1d8] sm:$0xff] %v637_v17 }
 0x117   :  { %681 = vst [vmem:[%s1361_s3 + $0xc8] sm:$0xff] %v501_v20  ;;  %713 = vst [vmem:[%s1361_s3 + $0x1c8] sm:$0xff] %v629_v21 }
 0x119   :  { %v863_v22 = vpop.f32.mrb[28].mxu0  ;;  %v895_v23 = vpop.f32.mrb[28].mxu1 }
 0x11a   :  { %v522_v24 = vadd.f32 %v863_v22, %v1100_v36  ;;  %v650_v25 = vadd.f32 %v895_v23, %v1100_v36  ;;  %v513_v26 = vpop.f32.mrb[29].mxu0  ;;  %v641_v27 = vpop.f32.mrb[29].mxu1 }
 0x11b   :  { %v514_v28 = vadd.f32 %v1100_v36, %v513_v26  ;;  %v642_v29 = vadd.f32 %v1100_v36, %v641_v27  ;;  %v864_v30 = vpop.f32.mrb[30].mxu0  ;;  %v896_v31 = vpop.f32.mrb[30].mxu1 }
 0x11c   :  { %686 = vst [vmem:[%s1361_s3 + $0xf0] sm:$0xff] %v522_v24  ;;  %718 = vst [vmem:[%s1361_s3 + $0x1f0] sm:$0xff] %v650_v25  ;;  %v525_v32 = vadd.f32 %v864_v30, %v1100_v36  ;;  %v653_v33 = vadd.f32 %v896_v31, %v1100_v36  ;;  %v516_v34 = vpop.f32.mrb[31].mxu0  ;;  %v644_v35 = vpop.f32.mrb[31].mxu1 }
 0x11d   :  { %684 = vst [vmem:[%s1361_s3 + $0xe0] sm:$0xff] %v514_v28  ;;  %716 = vst [vmem:[%s1361_s3 + $0x1e0] sm:$0xff] %v642_v29  ;;  %v517_v37 = vadd.f32 %v1100_v36, %v516_v34  ;;  %v645_v38 = vadd.f32 %v1100_v36, %v644_v35 }
 0x11e   :  { %687 = vst [vmem:[%s1361_s3 + $0xf8] sm:$0xff] %v525_v32  ;;  %719 = vst [vmem:[%s1361_s3 + $0x1f8] sm:$0xff] %v653_v33 }
 0x11f   :  { %685 = vst [vmem:[%s1361_s3 + $0xe8] sm:$0xff] %v517_v37  ;;  %717 = vst [vmem:[%s1361_s3 + $0x1e8] sm:$0xff] %v645_v38 }

</bundles_post_ra>
